<compile_context>
chip_gen: v7x
topology: tpu7x:2x2x1
jax: 0.10.0
libtpu: 0.0.40
codegen_flags: <defaults>
</compile_context>

<pallas_src>
import functools
import math

import jax
import jax.numpy as jnp
from jax.experimental import pallas as pl
from jax.experimental.pallas import tpu as pltpu

HID_CHANNELS = 2

# Hoisted constants (logs for constant-base powers, reciprocals for divisions).
_LN_A = math.log(0.7660379)
_LN_B = math.log(0.12117091)
_LN_C = math.log(1.2125463)
_LN_D = math.log(0.1562228)
_INV_03038 = 1.0 / 0.3038425
_INV_N07256 = 1.0 / -0.7256157
_INV_079082 = 1.0 / 0.79082423


def node_model_kernel(x_ref, col_ref, ea_ref, params_ref, out_ref, acc_ref, *,
                      node_in, edge_out, hid, node_out, tile_n):
    # x_ref      : [node_in,  tile_N] f32 (feature-major)
    # col_ref    : [tile_E, 1]        i32 (padded edges carry -1 -> dropped)
    # ea_ref     : [edge_out, tile_E] f32 (feature-major)
    # params_ref : [fan_in1*hid + hid + hid*node_out + node_out] f32 in SMEM
    # out_ref    : [node_out, tile_N] f32 (feature-major)
    # acc_ref    : [edge_out, tile_N] f32 scratch (scatter accumulator)
    e_step = pl.program_id(1)
    num_e = pl.num_programs(1)
    tile_e = col_ref.shape[0]

    # ---- init the scatter accumulator on the first E step ----
    @pl.when(e_step == 0)
    def _():
        acc_ref[...] = jnp.zeros_like(acc_ref)

    # ---- scatter_add(edge_attr, col) via transposed one-hot MXU matmul ----
    # onehot^T[k, n] = (col[k] == global_node_id(n)); out-of-range / padded
    # col values (-1) never match and are silently dropped.
    n_base = pl.program_id(0) * tile_n
    node_ids = n_base + jax.lax.broadcasted_iota(jnp.int32, (tile_e, tile_n), 1)
    onehot_t = (col_ref[...] == node_ids).astype(jnp.float32)      # [tile_E, tile_N]
    acc_ref[...] += jnp.dot(ea_ref[...], onehot_t,
                            preferred_element_type=jnp.float32)    # [edge_out, tile_N]

    # ---- epilogue on the last E step: MLP + symbolic formulas + residual ----
    @pl.when(e_step == num_e - 1)
    def _():
        xT = x_ref[...]                     # [node_in,  tile_N]
        out1T = acc_ref[...]                # [edge_out, tile_N]

        vi = xT[0:1, :]                     # x[:, 0]
        s1 = xT[1:2, :]                     # x[:, 1]
        s2 = xT[2:3, :]                     # x[:, 2]

        # Static offsets into the flattened params vector.
        fan_in1 = node_in + edge_out
        off_w1 = 0
        off_b1 = off_w1 + fan_in1 * hid
        off_w2 = off_b1 + hid
        off_b2 = off_w2 + hid * node_out

        def w1(k, j):
            return params_ref[off_w1 + k * hid + j]

        def b1(j):
            return params_ref[off_b1 + j]

        def w2(j, c):
            return params_ref[off_w2 + j * node_out + c]

        def b2(c):
            return params_ref[off_b2 + c]

        # node_mlp hidden layer as unrolled VPU broadcast-FMAs (hid is tiny).
        # Only needed for output columns >= 2 (cols 0/1 are overwritten).
        hs = []
        if node_out > 2:
            for j in range(hid):
                hj = b1(j)
                for k in range(node_in):
                    hj = hj + w1(k, j) * xT[k:k + 1, :]
                for k in range(edge_out):
                    hj = hj + w1(node_in + k, j) * out1T[k:k + 1, :]
                hs.append(jnp.maximum(hj, 0.0))                     # [1, tile_N]

        # Symbolic-regression expressions (constant-base powers as exp(z*ln c),
        # divisions replaced by multiplies with hoisted reciprocals).
        n1 = (jnp.exp(_LN_A * (s2 * _INV_03038 + s1))
              + jnp.exp(_LN_B * s1) * _INV_N07256) * jnp.exp(_LN_C * vi) + 0.12262904
        z = s2 + (s1 + (-3.283101) - vi * _INV_079082) * 0.31992579
        n1_n2 = 0.7872602 - jnp.sqrt(jnp.log(jnp.exp(_LN_D * z) + 1.4462701))

        # out[:,0] = n1 ; out[:,1] = n1_n2 - n1 ; residual add of x.
        out_ref[0:1, :] = (n1 + vi).astype(out_ref.dtype)
        out_ref[1:2, :] = (n1_n2 - n1 + s1).astype(out_ref.dtype)
        for c in range(2, node_out):
            yc = b2(c)
            for j in range(hid):
                yc = yc + w2(j, c) * hs[j]
            out_ref[c:c + 1, :] = (yc + xT[c:c + 1, :]).astype(out_ref.dtype)


def node_model_forward(x, edge_index, edge_attr, w1, b1, w2, b2,
                       *, tile_n=128, tile_e=256):
    """x: [N, node_in] f32, edge_index: [2, E] int, edge_attr: [E, edge_out] f32."""
    N, node_in = x.shape
    E, edge_out = edge_attr.shape
    hid = w1.shape[1]
    node_out = w2.shape[1]
    assert node_in >= 3, "formulas read x[:, 0:3]"
    assert node_out == node_in, "residual add requires node_out == node_in"

    n_tiles = pl.cdiv(N, tile_n)
    e_tiles = pl.cdiv(E, tile_e)
    n_pad = n_tiles * tile_n
    e_pad = e_tiles * tile_e

    # Feature-major (lane-dense) layout; pad nodes/edges up to tile multiples.
    x_t = jnp.zeros((node_in, n_pad), jnp.float32).at[:, :N].set(
        x.T.astype(jnp.float32))
    ea_t = jnp.zeros((edge_out, e_pad), jnp.float32).at[:, :E].set(
        edge_attr.T.astype(jnp.float32))
    col = jnp.full((e_pad, 1), -1, jnp.int32).at[:E, 0].set(
        edge_index[1].astype(jnp.int32))

    # Pack all MLP weights/biases into one flat SMEM vector.
    params = jnp.concatenate([
        w1.astype(jnp.float32).reshape(-1),
        b1.astype(jnp.float32).reshape(-1),
        w2.astype(jnp.float32).reshape(-1),
        b2.astype(jnp.float32).reshape(-1)])

    kernel = functools.partial(
        node_model_kernel, node_in=node_in, edge_out=edge_out, hid=hid,
        node_out=node_out, tile_n=tile_n)

    out_t = pl.pallas_call(
        kernel,
        out_shape=jax.ShapeDtypeStruct((node_out, n_pad), jnp.float32),
        grid=(n_tiles, e_tiles),
        in_specs=[
            # x^T: varies only with the node tile index (resident across E).
            pl.BlockSpec((node_in, tile_n), lambda i, e: (0, i)),
            # col: varies only with the edge tile index.
            pl.BlockSpec((tile_e, 1), lambda i, e: (e, 0)),
            # edge_attr^T: varies only with the edge tile index.
            pl.BlockSpec((edge_out, tile_e), lambda i, e: (0, e)),
            # Flat weights/biases as SMEM scalars (no padded VMEM tiles).
            pl.BlockSpec(memory_space=pltpu.MemorySpace.SMEM),
        ],
        out_specs=pl.BlockSpec((node_out, tile_n), lambda i, e: (0, i)),
        scratch_shapes=[pltpu.VMEM((edge_out, tile_n), jnp.float32)],
        compiler_params=pltpu.CompilerParams(
            dimension_semantics=("parallel", "arbitrary")),
    )(x_t, col, ea_t, params)

    return out_t[:, :N].T


def node_model_reference(x, edge_index, edge_attr, w1, b1, w2, b2):
    """Pure-JAX reference for verification."""
    N = x.shape[0]
    col = edge_index[1]
    out1 = jnp.zeros((N, edge_attr.shape[1]), jnp.float32).at[col].add(edge_attr)
    out_cat = jnp.concatenate([x, out1], axis=1)
    vi, s1, s2 = out_cat[:, 0], out_cat[:, 1], out_cat[:, 2]
    h = jnp.maximum(out_cat @ w1 + b1, 0.0)
    y = h @ w2 + b2
    n1 = ((0.7660379 ** (s2 / 0.3038425 + s1)
           + 0.12117091 ** s1 / -0.7256157) * 1.2125463 ** vi + 0.12262904)
    n1_n2 = 0.7872602 - jnp.sqrt(
        jnp.log(0.1562228 ** (s2 + (s1 + -3.283101 - vi / 0.79082423)
                              * 0.31992579) - -1.4462701))
    y = y.at[:, 0].set(n1)
    y = y.at[:, 1].set(n1_n2 - n1)
    return y + x


if __name__ == "__main__":
    key = jax.random.PRNGKey(0)
    k_x, k_ea, k_ei, k_w1, k_b1, k_w2, k_b2 = jax.random.split(key, 7)

    # Small graph, but large enough to exercise the (N-tile, E-tile) grid:
    # tile_n=128, tile_e=256  ->  grid = (2, 3) with padding.
    N = 200            # nodes
    E = 600            # edges
    node_in = 3
    node_out = 3
    edge_out = 3
    hid = HID_CHANNELS

    x = jax.random.normal(k_x, (N, node_in), dtype=jnp.float32)
    edge_attr = jax.random.normal(k_ea, (E, edge_out), dtype=jnp.float32)
    edge_index = jax.random.randint(k_ei, (2, E), 0, N, dtype=jnp.int32)

    # Deterministic Linear(node_in + edge_out, hid) / Linear(hid, node_out) init.
    fan_in1 = node_in + edge_out
    w1 = jax.random.uniform(k_w1, (fan_in1, hid), jnp.float32,
                            -1.0 / fan_in1 ** 0.5, 1.0 / fan_in1 ** 0.5)
    b1 = jax.random.uniform(k_b1, (hid,), jnp.float32,
                            -1.0 / fan_in1 ** 0.5, 1.0 / fan_in1 ** 0.5)
    w2 = jax.random.uniform(k_w2, (hid, node_out), jnp.float32,
                            -1.0 / hid ** 0.5, 1.0 / hid ** 0.5)
    b2 = jax.random.uniform(k_b2, (hid,) if False else (node_out,), jnp.float32,
                            -1.0 / hid ** 0.5, 1.0 / hid ** 0.5)

    out = node_model_forward(x, edge_index, edge_attr, w1, b1, w2, b2)
    out = jax.block_until_ready(out)

    ref = node_model_reference(x, edge_index, edge_attr, w1, b1, w2, b2)
    assert out.shape == ref.shape, "shape mismatch vs reference"
    assert jnp.allclose(out, ref, atol=1e-4, rtol=1e-4), "mismatch vs reference"

    print("KERNEL_OK")
</pallas_src>

<mosaic_0001>
module attributes {stable_mosaic.version = 11 : i64} {
  func.func @node_model_kernel(%arg0: i32, %arg1: i32, %arg2: memref<3x128xf32, #tpu.memory_space<vmem>>, %arg3: memref<256x1xi32, #tpu.memory_space<vmem>>, %arg4: memref<3x256xf32, #tpu.memory_space<vmem>>, %arg5: memref<23xf32, #tpu.memory_space<smem>>, %arg6: memref<3x128xf32, #tpu.memory_space<vmem>>, %arg7: memref<3x128xf32, #tpu.memory_space<vmem>>) attributes {dimension_semantics = [#tpu.dimension_semantics<parallel>, #tpu.dimension_semantics<arbitrary>], iteration_bounds = array<i64: 2, 3>, scalar_prefetch = 0 : i64, scratch_operands = 1 : i64, tpu.core_type = #tpu.core_type<tc>, window_params = [{transform_indices = @transform_0, window_bounds = array<i64: 3, 128>}, {transform_indices = @transform_1, window_bounds = array<i64: 256, 1>}, {transform_indices = @transform_2, window_bounds = array<i64: 3, 256>}, {transform_indices = @transform_3, window_bounds = array<i64: 23>}, {transform_indices = @transform_4, window_bounds = array<i64: 3, 128>}]} {
    %c0_i32 = arith.constant 0 : i32
    %0 = arith.cmpi eq, %arg1, %c0_i32 : i32
    %1 = arith.extui %0 : i1 to i32
    %c0_i32_0 = arith.constant 0 : i32
    %2 = arith.cmpi ne, %1, %c0_i32_0 : i32
    scf.if %2 {
      %cst_9 = arith.constant 0.000000e+00 : f32
      %20 = vector.broadcast %cst_9 : f32 to vector<3x128xf32>
      %c0_10 = arith.constant 0 : index
      %c0_11 = arith.constant 0 : index
      %21 = vector.load %arg7[%c0_10, %c0_11] : memref<3x128xf32, #tpu.memory_space<vmem>>, vector<3x128xf32>
      tpu.vector_store %arg7[%c0_10, %c0_11], %20 {strides = array<i32>} : memref<3x128xf32, #tpu.memory_space<vmem>>, vector<3x128xf32>,
    } else {
    }
    %c128_i32 = arith.constant 128 : i32
    %3 = arith.muli %arg0, %c128_i32 : i32
    %4 = tpu.iota {dimensions = array<i32: 1>} : vector<256x128xi32>
    %5 = vector.broadcast %3 : i32 to vector<256x128xi32>
    %6 = arith.addi %5, %4 : vector<256x128xi32>
    %c0 = arith.constant 0 : index
    %c0_1 = arith.constant 0 : index
    %7 = vector.load %arg3[%c0, %c0_1] : memref<256x1xi32, #tpu.memory_space<vmem>>, vector<256x1xi32>
    %8 = vector.broadcast %7 : vector<256x1xi32> to vector<256x128xi32>
    %9 = arith.cmpi eq, %8, %6 : vector<256x128xi32>
    %10 = arith.extui %9 : vector<256x128xi1> to vector<256x128xi32>
    %11 = arith.sitofp %10 : vector<256x128xi32> to vector<256x128xf32>
    %c0_2 = arith.constant 0 : index
    %c0_3 = arith.constant 0 : index
    %12 = vector.load %arg7[%c0_2, %c0_3] : memref<3x128xf32, #tpu.memory_space<vmem>>, vector<3x128xf32>
    %c0_4 = arith.constant 0 : index
    %c0_5 = arith.constant 0 : index
    %13 = vector.load %arg4[%c0_4, %c0_5] : memref<3x256xf32, #tpu.memory_space<vmem>>, vector<3x256xf32>
    %cst = arith.constant dense<0.000000e+00> : vector<3x128xf32>
    %14 = tpu.matmul %13, %11, %cst {dimension_numbers = #tpu.dot_dimension_numbers<[1], [0], [0], [1], [0, 0, 1, 1], [], []>} : vector<3x256xf32>, vector<256x128xf32>, vector<3x128xf32> -> vector<3x128xf32>
    %15 = arith.addf %12, %14 : vector<3x128xf32>
    %c0_6 = arith.constant 0 : index
    %c0_7 = arith.constant 0 : index
    %16 = vector.load %arg7[%c0_6, %c0_7] : memref<3x128xf32, #tpu.memory_space<vmem>>, vector<3x128xf32>
    tpu.vector_store %arg7[%c0_6, %c0_7], %15 {strides = array<i32>} : memref<3x128xf32, #tpu.memory_space<vmem>>, vector<3x128xf32>,
    %c2_i32 = arith.constant 2 : i32
    %17 = arith.cmpi eq, %arg1, %c2_i32 : i32
    %18 = arith.extui %17 : i1 to i32
    %c0_i32_8 = arith.constant 0 : i32
    %19 = arith.cmpi ne, %18, %c0_i32_8 : i32
    scf.if %19 {
      %c0_9 = arith.constant 0 : index
      %c0_10 = arith.constant 0 : index
      %20 = vector.load %arg2[%c0_9, %c0_10] : memref<3x128xf32, #tpu.memory_space<vmem>>, vector<3x128xf32>
      %c0_11 = arith.constant 0 : index
      %c0_12 = arith.constant 0 : index
      %21 = vector.load %arg7[%c0_11, %c0_12] : memref<3x128xf32, #tpu.memory_space<vmem>>, vector<3x128xf32>
      %22 = vector.extract_strided_slice %20 {offsets = [0, 0], sizes = [1, 128], strides = [1, 1]} : vector<3x128xf32> to vector<1x128xf32>
      %23 = vector.extract_strided_slice %20 {offsets = [1, 0], sizes = [1, 128], strides = [1, 1]} : vector<3x128xf32> to vector<1x128xf32>
      %24 = vector.extract_strided_slice %20 {offsets = [2, 0], sizes = [1, 128], strides = [1, 1]} : vector<3x128xf32> to vector<1x128xf32>
      %c12 = arith.constant 12 : index
      %25 = memref.load %arg5[%c12] : memref<23xf32, #tpu.memory_space<smem>>
      %c0_13 = arith.constant 0 : index
      %26 = memref.load %arg5[%c0_13] : memref<23xf32, #tpu.memory_space<smem>>
      %27 = vector.extract_strided_slice %20 {offsets = [0, 0], sizes = [1, 128], strides = [1, 1]} : vector<3x128xf32> to vector<1x128xf32>
      %28 = vector.broadcast %26 : f32 to vector<1x128xf32>
      %29 = arith.mulf %28, %27 : vector<1x128xf32>
      %30 = vector.broadcast %25 : f32 to vector<1x128xf32>
      %31 = arith.addf %30, %29 : vector<1x128xf32>
      %c2 = arith.constant 2 : index
      %32 = memref.load %arg5[%c2] : memref<23xf32, #tpu.memory_space<smem>>
      %33 = vector.extract_strided_slice %20 {offsets = [1, 0], sizes = [1, 128], strides = [1, 1]} : vector<3x128xf32> to vector<1x128xf32>
      %34 = vector.broadcast %32 : f32 to vector<1x128xf32>
      %35 = arith.mulf %34, %33 : vector<1x128xf32>
      %36 = arith.addf %31, %35 : vector<1x128xf32>
      %c4 = arith.constant 4 : index
      %37 = memref.load %arg5[%c4] : memref<23xf32, #tpu.memory_space<smem>>
      %38 = vector.extract_strided_slice %20 {offsets = [2, 0], sizes = [1, 128], strides = [1, 1]} : vector<3x128xf32> to vector<1x128xf32>
      %39 = vector.broadcast %37 : f32 to vector<1x128xf32>
      %40 = arith.mulf %39, %38 : vector<1x128xf32>
      %41 = arith.addf %36, %40 : vector<1x128xf32>
      %c6 = arith.constant 6 : index
      %42 = memref.load %arg5[%c6] : memref<23xf32, #tpu.memory_space<smem>>
      %43 = vector.extract_strided_slice %21 {offsets = [0, 0], sizes = [1, 128], strides = [1, 1]} : vector<3x128xf32> to vector<1x128xf32>
      %44 = vector.broadcast %42 : f32 to vector<1x128xf32>
      %45 = arith.mulf %44, %43 : vector<1x128xf32>
      %46 = arith.addf %41, %45 : vector<1x128xf32>
      %c8 = arith.constant 8 : index
      %47 = memref.load %arg5[%c8] : memref<23xf32, #tpu.memory_space<smem>>
      %48 = vector.extract_strided_slice %21 {offsets = [1, 0], sizes = [1, 128], strides = [1, 1]} : vector<3x128xf32> to vector<1x128xf32>
      %49 = vector.broadcast %47 : f32 to vector<1x128xf32>
      %50 = arith.mulf %49, %48 : vector<1x128xf32>
      %51 = arith.addf %46, %50 : vector<1x128xf32>
      %c10 = arith.constant 10 : index
      %52 = memref.load %arg5[%c10] : memref<23xf32, #tpu.memory_space<smem>>
      %53 = vector.extract_strided_slice %21 {offsets = [2, 0], sizes = [1, 128], strides = [1, 1]} : vector<3x128xf32> to vector<1x128xf32>
      %54 = vector.broadcast %52 : f32 to vector<1x128xf32>
      %55 = arith.mulf %54, %53 : vector<1x128xf32>
      %56 = arith.addf %51, %55 : vector<1x128xf32>
      %cst_14 = arith.constant 0.000000e+00 : f32
      %57 = vector.broadcast %cst_14 : f32 to vector<1x128xf32>
      %58 = arith.maximumf %56, %57 : vector<1x128xf32>
      %c13 = arith.constant 13 : index
      %59 = memref.load %arg5[%c13] : memref<23xf32, #tpu.memory_space<smem>>
      %c1 = arith.constant 1 : index
      %60 = memref.load %arg5[%c1] : memref<23xf32, #tpu.memory_space<smem>>
      %61 = vector.extract_strided_slice %20 {offsets = [0, 0], sizes = [1, 128], strides = [1, 1]} : vector<3x128xf32> to vector<1x128xf32>
      %62 = vector.broadcast %60 : f32 to vector<1x128xf32>
      %63 = arith.mulf %62, %61 : vector<1x128xf32>
      %64 = vector.broadcast %59 : f32 to vector<1x128xf32>
      %65 = arith.addf %64, %63 : vector<1x128xf32>
      %c3 = arith.constant 3 : index
      %66 = memref.load %arg5[%c3] : memref<23xf32, #tpu.memory_space<smem>>
      %67 = vector.extract_strided_slice %20 {offsets = [1, 0], sizes = [1, 128], strides = [1, 1]} : vector<3x128xf32> to vector<1x128xf32>
      %68 = vector.broadcast %66 : f32 to vector<1x128xf32>
      %69 = arith.mulf %68, %67 : vector<1x128xf32>
      %70 = arith.addf %65, %69 : vector<1x128xf32>
      %c5 = arith.constant 5 : index
      %71 = memref.load %arg5[%c5] : memref<23xf32, #tpu.memory_space<smem>>
      %72 = vector.extract_strided_slice %20 {offsets = [2, 0], sizes = [1, 128], strides = [1, 1]} : vector<3x128xf32> to vector<1x128xf32>
      %73 = vector.broadcast %71 : f32 to vector<1x128xf32>
      %74 = arith.mulf %73, %72 : vector<1x128xf32>
      %75 = arith.addf %70, %74 : vector<1x128xf32>
      %c7 = arith.constant 7 : index
      %76 = memref.load %arg5[%c7] : memref<23xf32, #tpu.memory_space<smem>>
      %77 = vector.extract_strided_slice %21 {offsets = [0, 0], sizes = [1, 128], strides = [1, 1]} : vector<3x128xf32> to vector<1x128xf32>
      %78 = vector.broadcast %76 : f32 to vector<1x128xf32>
      %79 = arith.mulf %78, %77 : vector<1x128xf32>
      %80 = arith.addf %75, %79 : vector<1x128xf32>
      %c9 = arith.constant 9 : index
      %81 = memref.load %arg5[%c9] : memref<23xf32, #tpu.memory_space<smem>>
      %82 = vector.extract_strided_slice %21 {offsets = [1, 0], sizes = [1, 128], strides = [1, 1]} : vector<3x128xf32> to vector<1x128xf32>
      %83 = vector.broadcast %81 : f32 to vector<1x128xf32>
      %84 = arith.mulf %83, %82 : vector<1x128xf32>
      %85 = arith.addf %80, %84 : vector<1x128xf32>
      %c11 = arith.constant 11 : index
      %86 = memref.load %arg5[%c11] : memref<23xf32, #tpu.memory_space<smem>>
      %87 = vector.extract_strided_slice %21 {offsets = [2, 0], sizes = [1, 128], strides = [1, 1]} : vector<3x128xf32> to vector<1x128xf32>
      %88 = vector.broadcast %86 : f32 to vector<1x128xf32>
      %89 = arith.mulf %88, %87 : vector<1x128xf32>
      %90 = arith.addf %85, %89 : vector<1x128xf32>
      %cst_15 = arith.constant 0.000000e+00 : f32
      %91 = vector.broadcast %cst_15 : f32 to vector<1x128xf32>
      %92 = arith.maximumf %90, %91 : vector<1x128xf32>
      %cst_16 = arith.constant 3.2911787 : f32
      %93 = vector.broadcast %cst_16 : f32 to vector<1x128xf32>
      %94 = arith.mulf %24, %93 : vector<1x128xf32>
      %95 = arith.addf %94, %23 : vector<1x128xf32>
      %cst_17 = arith.constant -0.266523629 : f32
      %96 = vector.broadcast %cst_17 : f32 to vector<1x128xf32>
      %97 = arith.mulf %96, %95 : vector<1x128xf32>
      %98 = math.exp %97 : vector<1x128xf32>
      %cst_18 = arith.constant -2.11055326 : f32
      %99 = vector.broadcast %cst_18 : f32 to vector<1x128xf32>
      %100 = arith.mulf %99, %23 : vector<1x128xf32>
      %101 = math.exp %100 : vector<1x128xf32>
      %cst_19 = arith.constant -1.378140e+00 : f32
      %102 = vector.broadcast %cst_19 : f32 to vector<1x128xf32>
      %103 = arith.mulf %101, %102 : vector<1x128xf32>
      %104 = arith.addf %98, %103 : vector<1x128xf32>
      %cst_20 = arith.constant 0.192722529 : f32
      %105 = vector.broadcast %cst_20 : f32 to vector<1x128xf32>
      %106 = arith.mulf %105, %22 : vector<1x128xf32>
      %107 = math.exp %106 : vector<1x128xf32>
      %108 = arith.mulf %104, %107 : vector<1x128xf32>
      %cst_21 = arith.constant 0.122629039 : f32
      %109 = vector.broadcast %cst_21 : f32 to vector<1x128xf32>
      %110 = arith.addf %108, %109 : vector<1x128xf32>
      %cst_22 = arith.constant -3.28310108 : f32
      %111 = vector.broadcast %cst_22 : f32 to vector<1x128xf32>
      %112 = arith.addf %23, %111 : vector<1x128xf32>
      %cst_23 = arith.constant 1.26450348 : f32
      %113 = vector.broadcast %cst_23 : f32 to vector<1x128xf32>
      %114 = arith.mulf %22, %113 : vector<1x128xf32>
      %115 = arith.subf %112, %114 : vector<1x128xf32>
      %cst_24 = arith.constant 0.319925785 : f32
      %116 = vector.broadcast %cst_24 : f32 to vector<1x128xf32>
      %117 = arith.mulf %115, %116 : vector<1x128xf32>
      %118 = arith.addf %24, %117 : vector<1x128xf32>
      %cst_25 = arith.constant -1.85647213 : f32
      %119 = vector.broadcast %cst_25 : f32 to vector<1x128xf32>
      %120 = arith.mulf %119, %118 : vector<1x128xf32>
      %121 = math.exp %120 : vector<1x128xf32>
      %cst_26 = arith.constant 1.44627011 : f32
      %122 = vector.broadcast %cst_26 : f32 to vector<1x128xf32>
      %123 = arith.addf %121, %122 : vector<1x128xf32>
      %124 = math.log %123 : vector<1x128xf32>
      %125 = math.sqrt %124 : vector<1x128xf32>
      %cst_27 = arith.constant 0.787260174 : f32
      %126 = vector.broadcast %cst_27 : f32 to vector<1x128xf32>
      %127 = arith.subf %126, %125 : vector<1x128xf32>
      %128 = arith.addf %110, %22 : vector<1x128xf32>
      %c0_28 = arith.constant 0 : index
      %c0_29 = arith.constant 0 : index
      %129 = vector.load %arg6[%c0_28, %c0_29] : memref<3x128xf32, #tpu.memory_space<vmem>>, vector<1x128xf32>
      tpu.vector_store %arg6[%c0_28, %c0_29], %128 {strides = array<i32>} : memref<3x128xf32, #tpu.memory_space<vmem>>, vector<1x128xf32>,
      %130 = arith.subf %127, %110 : vector<1x128xf32>
      %131 = arith.addf %130, %23 : vector<1x128xf32>
      %c1_30 = arith.constant 1 : index
      %c0_31 = arith.constant 0 : index
      %132 = vector.load %arg6[%c1_30, %c0_31] : memref<3x128xf32, #tpu.memory_space<vmem>>, vector<1x128xf32>
      tpu.vector_store %arg6[%c1_30, %c0_31], %131 {strides = array<i32>} : memref<3x128xf32, #tpu.memory_space<vmem>>, vector<1x128xf32>,
      %c22 = arith.constant 22 : index
      %133 = memref.load %arg5[%c22] : memref<23xf32, #tpu.memory_space<smem>>
      %c16 = arith.constant 16 : index
      %134 = memref.load %arg5[%c16] : memref<23xf32, #tpu.memory_space<smem>>
      %135 = vector.broadcast %134 : f32 to vector<1x128xf32>
      %136 = arith.mulf %135, %58 : vector<1x128xf32>
      %137 = vector.broadcast %133 : f32 to vector<1x128xf32>
      %138 = arith.addf %137, %136 : vector<1x128xf32>
      %c19 = arith.constant 19 : index
      %139 = memref.load %arg5[%c19] : memref<23xf32, #tpu.memory_space<smem>>
      %140 = vector.broadcast %139 : f32 to vector<1x128xf32>
      %141 = arith.mulf %140, %92 : vector<1x128xf32>
      %142 = arith.addf %138, %141 : vector<1x128xf32>
      %143 = vector.extract_strided_slice %20 {offsets = [2, 0], sizes = [1, 128], strides = [1, 1]} : vector<3x128xf32> to vector<1x128xf32>
      %144 = arith.addf %142, %143 : vector<1x128xf32>
      %c2_32 = arith.constant 2 : index
      %c0_33 = arith.constant 0 : index
      %145 = vector.load %arg6[%c2_32, %c0_33] : memref<3x128xf32, #tpu.memory_space<vmem>>, vector<1x128xf32>
      tpu.vector_store %arg6[%c2_32, %c0_33], %144 {strides = array<i32>} : memref<3x128xf32, #tpu.memory_space<vmem>>, vector<1x128xf32>,
    } else {
    }
    return
  }
  func.func @transform_0(%arg0: i32, %arg1: i32) -> (i32, i32) {
    %c0_i32 = arith.constant 0 : i32
    %c0_i32_0 = arith.constant 0 : i32
    return %c0_i32, %arg0 : i32, i32
  }
  func.func @transform_1(%arg0: i32, %arg1: i32) -> (i32, i32) {
    %c0_i32 = arith.constant 0 : i32
    %c0_i32_0 = arith.constant 0 : i32
    return %arg1, %c0_i32 : i32, i32
  }
  func.func @transform_2(%arg0: i32, %arg1: i32) -> (i32, i32) {
    %c0_i32 = arith.constant 0 : i32
    %c0_i32_0 = arith.constant 0 : i32
    return %c0_i32, %arg1 : i32, i32
  }
  func.func @transform_3(%arg0: i32, %arg1: i32) -> i32 {
    %c0_i32 = arith.constant 0 : i32
    %c0_i32_0 = arith.constant 0 : i32
    return %c0_i32 : i32
  }
  func.func @transform_4(%arg0: i32, %arg1: i32) -> (i32, i32) {
    %c0_i32 = arith.constant 0 : i32
    %c0_i32_0 = arith.constant 0 : i32
    return %c0_i32, %arg0 : i32, i32
  }
}

</mosaic_0001>

<bundles_post_ra>
// kernel: tpu_custom_call.1
= control target key start
LH: loop header
LB: loop body
LE: loop exit
PB: predicated region body
PF: predicated region fallthrough
CT: control target
= control target key end

     0   :  { %s1571_s0 = inlined_call_operand.vmem [shape: f32[3,256], index: 0, kind: input, shape index: {}]   ;;  %s1572_s1 = inlined_call_operand.vmem [shape: s32[768,1], index: 1, kind: input, shape index: {}]   ;;  %s1573_s2 = inlined_call_operand.vmem [shape: f32[3,768], index: 2, kind: input, shape index: {}]   ;;  %s1574_s3 = inlined_call_operand.vmem [shape: f32[23], index: 3, kind: input, shape index: {}]   ;;  %s1575_s4 = inlined_call_operand.hbm [shape: f32[3,256], index: 4, kind: output, shape index: {}]  }
   0x1   :  { %1578 = sst [smem:[#allocation11_spill]] %s1574_s3 }
   0x2   :  { %9 = vsyncpa [#allocation5], 0 }
   0x3   :  { %10 = vsyncpa [#allocation4], 0 }
   0x4   :  { %12 = vsyncpa [#allocation4 + $0x1], 0  ;;  %s1260_s15 = smov 0   ;;  %s1262_s16 = smov 0  }
   0x5   :  { %s1264_s17 = smov 0   ;;  %s1266_s18 = smov 0  }
   0x6   :  { %s1268_s19 = smov 0   ;;  %s1270_s20 = smov 0  }
   0x7   :  { %s1272_s21 = smov 0   ;;  %s1274_s22 = smov 0  }
   0x8 LB: > { %s848_s23 = sadd.s32 4294967295, %s1228_s22   ;;  %s849_s24 = sadd.s32 4294967294, %s1228_s22   ;;  %s1228_s22 = sphi %s1274_s22, %s18_s22   ;;  %s1224_s21 = sphi %s1272_s21, %s1596_s21   ;;  %s1220_s20 = sphi %s1270_s20, %s1595_s20   ;;  %s1216_s19 = sphi %s1268_s19, %s1594_s19   ;;  %s1212_s18 = sphi %s1266_s18, %s1593_s18   ;;  %s1208_s17 = sphi %s1264_s17, %s1592_s17   ;;  %s1204_s16 = sphi %s1262_s16, %s1591_s16   ;;  %s1200_s15 = sphi %s1260_s15, %s1590_s15  }
   0x9   : > { %s27_s25 = sadd.s32 1, %s1220_s20  ;;  %s30_s26 = sadd.s32 1, %s1224_s21 }
   0xa   : > { %p28_p0 = scmp.ge.s32.totalorder %s27_s25, 3  ;;  %s136_s27 = sadd.s32 1, %s1208_s17 }
   0xb   : > { %p146_p1 = scmp.ne.s32.totalorder %s1208_s17, %s1204_s16  ;;  %p147_p2 = scmp.eq.s32.totalorder %s848_s23, 5 }
   0xc   : > { %s1598_s25 = smov (%p28_p0, %s27_s25), 0  ;;  %s1600_s26 = smov (!%p28_p0, %s30_s26), %s1224_s21 }
   0xd   : > { %1579 = sst [smem:[#allocation9_spill]] %s1598_s25  ;;  %p1310_p3 = por %p147_p2, %p146_p1 }
   0xe   : > { %p152_p4 = scmp.ne.s32.totalorder %s1204_s16, %s1200_s15  ;;  %p32_p5 = scmp.ge.s32.totalorder %s1600_s26, 2 }
   0xf   : > { %p153_p6 = scmp.eq.s32.totalorder %s849_s24, 5  ;;  %p850_p7 = scmp.ge.s32.totalorder %s1228_s22, 1 }
  0x10   : > { %p160_p8 = scmp.lt.s32.totalorder %s1228_s22, 7  ;;  %s1602_s26 = smov (%p32_p5, %s1600_s26), 0 }
  0x11   : > { %1581 = sst [smem:[#allocation10_spill]] %s1602_s26  ;;  %p1320_p9 = por %p153_p6, %p152_p4 }
  0x12   : > { %p1324_p10 = pnand %p850_p7, %p160_p8  ;;  %s133_s5 = ssub.s32 %s1224_s21, %s1602_s26 }
  0x13   : > { %s1582_s29 = scalar_select %p1320_p9, 1, 0 }
  0x14   : > { %p134_p11 = scmp.eq.s32.totalorder %s133_s5, 0  ;;  %p1021_p12 = pneg %p1324_p10 }
  0x15   : > { %p1332_p13 = scmp.eq.s32.totalorder %s848_s23, 0  ;;  %s1585_s3 = sld [smem:[#allocation11_spill]] }
  0x16   : > { %s1340_s10 = scalar_select %p134_p11, %s1208_s17, %s136_s27  }
  0x17   : > { %p1022_p0 = pnand %p1332_p13, %p1021_p12 }
  0x19   : > { %p1117_p2 = pneg %p1022_p0 }
  0x1b   : > { %s173_s9 = sshll.u32 %s1585_s3, 4  ;;  %s174_s9 = int_to_ptr.vmem [resolvable:$true] %s173_s9 }
  0x1c   : > { %s1115_s11 = scalar_lea.vmem %s174_s9, 16  ;;  %p1123_p6 = scmp.lt.s32.totalorder %s174_s9, %s174_s9 }
  0x1d   : > { %p1116_p1 = scmp.ne.s32.totalorder %s174_s9, %s1115_s11  ;;  %p1124_p7 = scmp.lt.s32.totalorder %s1115_s11, %s1115_s11 }
  0x1f   : > { %p1118_p4 = pnand %p1117_p2, %p1116_p1  ;;  %p1125_p8 = por %p1124_p7, %p1123_p6 }
  0x21   : > { %p1119_p5 = pneg %p1118_p4 }
  0x23   : > { %p1126_p9 = pnand %p1125_p8, %p1119_p5 }
  0x25   : > { %1129 = shalt.err (!%p1126_p9)
}
  0x26   : > { %s1230_s12 = smov [#allocation3]   ;;  %211 = sbr.rel (%p1324_p10) target bundleno = 537 (0x219), region = 36 }
  0x27   : > { %1024 = dma.vmem_to_smem (!%p1022_p0), %s174_s9, 16, %s1230_s12, [#allocation5]  }
  0x2d   : > { %1191 = dma.done.wait (%p1332_p13), [#allocation5], 16  }
  0x2e   : > { %1193 = vsyncadd (%p1332_p13), [#allocation5], 4294967280 }
  0x2f   : > { %217 = sfence }
  0x30   : > { %s1576_s13 = sand.u32 1, %s1204_s16   ;;  %p247_p9 = scmp.lt.s32.totalorder %s1216_s19, 1 }
  0x31   : > { %s855_s14 = sshll.u32 %s1576_s13, 2  ;;  %s857_s23 = sshll.u32 %s1212_s18, 5 }
  0x32   : > { %p252_p11 = scmp.lt.s32.totalorder %s857_s23, 95  ;;  %s859_s30 = sshll.u32 %s1212_s18, 1 }
  0x33   : > { %s248_s24 = scalar_select %p247_p9, %s1216_s19, 1 }
  0x34   : > { %s1604_s23 = smov (!%p252_p11, %s857_s23), 95  ;;  %p258_p10 = scmp.lt.s32.totalorder %s859_s30, 5 }
  0x35   : > { %s856_s27 = sshll.u32 %s248_s24, 2  ;;  %s858_s8 = sshll.u32 %s1604_s23, 3 }
  0x36   : > { %s1360_s7 = scalar_lea.vmem %s1571_s0, %s856_s27  ;;  %s1365_s12 = scalar_lea.vmem %s1572_s1, %s858_s8 }
  0x37   : > { %s1606_s30 = smov (!%p258_p10, %s859_s30), 5  ;;  %s1372_s24 = scalar_lea.vmem [#allocation6], %s855_s14 }
  0x38   : > { %s860_s13 = sshll.u32 %s1606_s30, 2  ;;  %p861_p12 = scmp.ne.s32.totalorder %s1212_s18, 0 }
  0x39   : > { %s1370_s25 = scalar_lea.vmem %s1573_s2, %s860_s13  ;;  %v1231_v0 = vmov (!%p861_p12), 0.0  }
  0x3a   : > { %266 = sbr.rel (%p861_p12) target bundleno = 65 (0x41), region = 44  ;;  %267 = vst [vmem:[#allocation2] sm:$0x7] (!%p861_p12), %v1231_v0 }
  0x41 PF: > { %v289_v1 = vld [vmem:[%s1365_s12 + $0x80] sm:$0xff]  ;;  %v1232_v3 = vmov 0   ;;  %v290_v4 = vld [vmem:[%s1365_s12 + $0x88] sm:$0xff]  ;;  %v291_v6 = vld [vmem:[%s1365_s12 + $0x90] sm:$0xff]  ;;  %v269_v36 = vlaneseq  ;;  %s862_s3 = sshll.u32 %s1216_s19, 7  ;;  %p927_p13 = scmp.ne.s32.totalorder %s1212_s18, 2 }
  0x42   : > { %v273_v2 = vld [vmem:[%s1365_s12] sm:$0xff]  ;;  %1101 = vset.pattern.permute.xlu1 %v1232_v3  ;;  %1100 = vset.pattern.permute.xlu0 %v1232_v3  ;;  %v274_v5 = vld [vmem:[%s1365_s12 + $0x8] sm:$0xff]  ;;  %v292_v7 = vld [vmem:[%s1365_s12 + $0x98] sm:$0xff]  ;;  %v271_v38 = vstv %s862_s3  ;;  %v1233_v44 = vmov 1.0|1.0   ;;  %s581_s18 = sld [smem:[#allocation3]] (!%p927_p13) }
  0x43   : > { %354 = vperm.xlu0 %1100, %v289_v1   ;;  %306 = vperm.xlu1 %1101, %v273_v2   ;;  %v275_v8 = vld [vmem:[%s1365_s12 + $0x10] sm:$0xff]  ;;  %v276_v9 = vld [vmem:[%s1365_s12 + $0x18] sm:$0xff]  ;;  %v293_v10 = vld [vmem:[%s1365_s12 + $0xa0] sm:$0xff]  ;;  %v270_v37 = vand.u32 127, %v269_v36  ;;  %s929_s26 = sld [smem:[#allocation3 + $0x2]] (!%p927_p13)  ;;  %s930_s13 = sld [smem:[#allocation3 + $0x4]] (!%p927_p13) }
  0x44   : > { %v294_v11 = vld [vmem:[%s1365_s12 + $0xa8] sm:$0xff]  ;;  %v277_v12 = vld [vmem:[%s1365_s12 + $0x20] sm:$0xff]  ;;  %v295_v14 = vld [vmem:[%s1365_s12 + $0xb0] sm:$0xff]  ;;  %s931_s14 = sld [smem:[#allocation3 + $0x6]] (!%p927_p13)  ;;  %s932_s23 = sld [smem:[#allocation3 + $0x8]] (!%p927_p13) }
  0x45   : > { %v278_v13 = vld [vmem:[%s1365_s12 + $0x28] sm:$0xff]  ;;  %v296_v15 = vld [vmem:[%s1365_s12 + $0xb8] sm:$0xff]  ;;  %v279_v16 = vld [vmem:[%s1365_s12 + $0x30] sm:$0xff]  ;;  %v1413_v41 = vadd.s32 %v271_v38, %v270_v37  ;;  %s1478_s27 = sld [smem:[#allocation3 + $0xa]] (!%p927_p13)  ;;  %s1480_s30 = sld [smem:[#allocation3 + $0xd]] (!%p927_p13) }
  0x46   : > { %v280_v17 = vld [vmem:[%s1365_s12 + $0x38] sm:$0xff]  ;;  %v297_v18 = vld [vmem:[%s1365_s12 + $0xc0] sm:$0xff]  ;;  %v298_v19 = vld [vmem:[%s1365_s12 + $0xc8] sm:$0xff]  ;;  %s935_s5 = sld [smem:[#allocation3 + $0x1]] (!%p927_p13)  ;;  %s1482_s6 = sld [smem:[#allocation3 + $0x3]] (!%p927_p13) }
  0x47   : > { %357 = vperm.xlu0 %1100, %v290_v4   ;;  %309 = vperm.xlu1 %1101, %v274_v5   ;;  %v281_v20 = vld [vmem:[%s1365_s12 + $0x40] sm:$0xff]  ;;  %v282_v21 = vld [vmem:[%s1365_s12 + $0x48] sm:$0xff]  ;;  %v299_v22 = vld [vmem:[%s1365_s12 + $0xd0] sm:$0xff]  ;;  %s1489_s8 = sld [smem:[#allocation3 + $0x7]] (!%p927_p13)  ;;  %s1492_s9 = sld [smem:[#allocation3 + $0x9]] (!%p927_p13) }
  0x48   : > { %v300_v23 = vld [vmem:[%s1365_s12 + $0xd8] sm:$0xff]  ;;  %v283_v24 = vld [vmem:[%s1365_s12 + $0x50] sm:$0xff]  ;;  %v301_v26 = vld [vmem:[%s1365_s12 + $0xe0] sm:$0xff]  ;;  %s1495_s11 = sld [smem:[#allocation3 + $0xb]] (!%p927_p13)  ;;  %s941_s3 = sld [smem:[#allocation3 + $0x16]] (!%p927_p13) }
  0x49   : > { %v284_v25 = vld [vmem:[%s1365_s12 + $0x58] sm:$0xff]  ;;  %v302_v27 = vld [vmem:[%s1365_s12 + $0xe8] sm:$0xff]  ;;  %v285_v28 = vld [vmem:[%s1365_s12 + $0x60] sm:$0xff]  ;;  %v594_v36 = vstv (!%p927_p13), %s930_s13 }
  0x4a   : > { %v286_v29 = vld [vmem:[%s1365_s12 + $0x68] sm:$0xff]  ;;  %v303_v30 = vld [vmem:[%s1365_s12 + $0xf0] sm:$0xff]  ;;  %v304_v31 = vld [vmem:[%s1365_s12 + $0xf8] sm:$0xff]  ;;  %v601_v38 = vstv (!%p927_p13), %s931_s14 }
  0x4b   : > { %360 = vperm.xlu0 %1100, %v291_v6   ;;  %363 = vperm.xlu1 %1101, %v292_v7   ;;  %v287_v32 = vld [vmem:[%s1365_s12 + $0x70] sm:$0xff]  ;;  %v288_v33 = vld [vmem:[%s1365_s12 + $0x78] sm:$0xff]  ;;  %v1408_v34 = vld [vmem:[%s1370_s25] sm:$0x77]  ;;  %s1468_s25 = sld [smem:[#allocation3 + $0xc]] (!%p927_p13)  ;;  %s1502_s12 = sld [smem:[#allocation3 + $0x10]] (!%p927_p13) }
  0x4c   : > { %v500_v35 = vcombine.high %v1408_v34, %v1408_v34 }
  0x4e   : > { %566 = vmatprep.mubr.f32.mxu0 %v500_v35 }
  0x4f   : > { %312 = vperm.xlu0 %1100, %v275_v8   ;;  %315 = vperm.xlu1 %1101, %v276_v9  }
  0x53   : > { %366 = vperm.xlu0 %1100, %v293_v10   ;;  %369 = vperm.xlu1 %1101, %v294_v11   ;;  %v497_v10 = vld [vmem:[#allocation2] sm:$0x7] }
  0x57   : > { %318 = vperm.xlu0 %1100, %v277_v12   ;;  %321 = vperm.xlu1 %1101, %v278_v13  }
  0x5b   : > { %372 = vperm.xlu0 %1100, %v295_v14   ;;  %375 = vperm.xlu1 %1101, %v296_v15   ;;  %v1466_v14 = vld [vmem:[%s1360_s7] sm:$0x7] (!%p927_p13)  ;;  %s1484_s7 = sld [smem:[#allocation3 + $0x5]] (!%p927_p13) }
  0x5c   : > { %v658_v15 = vmul.f32 (!%p927_p13), 3.2911787, %v1466_v14  ;;  %v595_v37 = vmul.f32 (!%p927_p13), %v594_v36, %v1466_v14 }
  0x5f   : > { %324 = vperm.xlu0 %1100, %v279_v16   ;;  %327 = vperm.xlu1 %1101, %v280_v17   ;;  %v660_v16 = vrot.slane (!%p927_p13), %v1466_v14, 7  ;;  %v666_v17 = vmul.f32 (!%p927_p13), -2.1105533, %v1466_v14 }
  0x63   : > { %378 = vperm.xlu0 %1100, %v297_v18   ;;  %381 = vperm.xlu1 %1101, %v298_v19   ;;  %v674_v18 = vmul.f32 (!%p927_p13), 0.19272253, %v1466_v14  ;;  %v682_v19 = vadd.f32 (!%p927_p13), -3.283101, %v1466_v14 }
  0x67   : > { %330 = vperm.xlu0 %1100, %v281_v20   ;;  %333 = vperm.xlu1 %1101, %v282_v21   ;;  %v683_v20 = vmul.f32 (!%p927_p13), 1.2645035, %v1466_v14  ;;  %v662_v21 = vadd.f32 (!%p927_p13), %v660_v16, %v658_v15 }
  0x6b   : > { %384 = vperm.xlu0 %1100, %v299_v22   ;;  %387 = vperm.xlu1 %1101, %v300_v23   ;;  %v667_v22 = vmul.f32 (!%p927_p13), 1.442695, %v666_v17  ;;  %v675_v23 = vmul.f32 (!%p927_p13), 1.442695, %v674_v18 }
  0x6d   : > { %1103 = vpow2.f32 (!%p927_p13), %v667_v22 }
  0x6e   : > { %1105 = vpow2.f32 (!%p927_p13), %v675_v23 }
  0x6f   : > { %336 = vperm.xlu0 %1100, %v283_v24   ;;  %339 = vperm.xlu1 %1101, %v284_v25   ;;  %v685_v24 = vrot.slane (!%p927_p13), %v683_v20, 7  ;;  %v663_v25 = vmul.f32 (!%p927_p13), -0.26652363, %v662_v21 }
  0x73   : > { %390 = vperm.xlu0 %1100, %v301_v26   ;;  %393 = vperm.xlu1 %1101, %v302_v27   ;;  %v687_v26 = vsub.f32 (!%p927_p13), %v682_v19, %v685_v24  ;;  %v664_v27 = vmul.f32 (!%p927_p13), 1.442695, %v663_v25  ;;  %v707_v19 = vrot.slane (!%p927_p13), %v1466_v14, 6  ;;  %v716_v25 = vstv (!%p927_p13), %s1502_s12 }
  0x75   : > { %1107 = vpow2.f32 (!%p927_p13), %v664_v27 }
  0x77   : > { %342 = vperm.xlu0 %1100, %v285_v28   ;;  %345 = vperm.xlu1 %1101, %v286_v29   ;;  %v688_v28 = vmul.f32 (!%p927_p13), 0.31992579, %v687_v26 }
  0x7b   : > { %396 = vperm.xlu0 %1100, %v303_v30   ;;  %399 = vperm.xlu1 %1101, %v304_v31   ;;  %v582_v30 = vstv (!%p927_p13), %s581_s18  ;;  %v584_v31 = vstv (!%p927_p13), %s1468_s25  ;;  %s943_s25 = sld [smem:[#allocation3 + $0x13]] (!%p927_p13) }
  0x7f   : > { %348 = vperm.xlu0 %1100, %v287_v32   ;;  %351 = vperm.xlu1 %1101, %v288_v33   ;;  %v587_v32 = vstv (!%p927_p13), %s929_s26  ;;  %v690_v33 = vrot.slane (!%p927_p13), %v688_v28, 7 }
  0x80   : > { %v588_v35 = vmul.f32 (!%p927_p13), %v587_v32, %v1466_v14 }
  0xc2   : > { %v355_v39 = vpop.permute.xlu0 %354  ;;  %v307_v40 = vpop.permute.xlu1 %306 }
  0xc3   : > { %vm401_vm0 = vcmp.eq.s32.totalorder %v307_v40, %v1413_v41  ;;  %vm417_vm3 = vcmp.eq.s32.totalorder %v355_v39, %v1413_v41  ;;  %v605_v39 = vstv (!%p927_p13), %s932_s23  ;;  %v692_v40 = vadd.f32 (!%p927_p13), %v690_v33, %v1466_v14 }
  0xc6   : > { %v358_v42 = vpop.permute.xlu0 %357  ;;  %v310_v43 = vpop.permute.xlu1 %309 }
  0xc7   : > { %vm418_vm1 = vcmp.eq.s32.totalorder %v358_v42, %v1413_v41  ;;  %vm402_vm2 = vcmp.eq.s32.totalorder %v310_v43, %v1413_v41  ;;  %v590_v42 = vrot.slane (!%p927_p13), %v588_v35, 1  ;;  %v721_v35 = vstv (!%p927_p13), %s943_s25 }
  0xc8   : > { %vm985_vm4 = vmpackc.low %vm402_vm2, %vm401_vm0 }
  0xc9   : > { %vm983_vm5 = vmpackc.low %vm418_vm1, %vm417_vm3 }
  0xca   : > { %984 = vmatprep.subr.msk.bf16.mxu0 %vm983_vm5, %v1233_v44  ;;  %v361_v45 = vpop.permute.xlu0 %360  ;;  %v364_v46 = vpop.permute.xlu1 %363 }
  0xcb   : > { %vm419_vm6 = vcmp.eq.s32.totalorder %v361_v45, %v1413_v41  ;;  %vm420_vm7 = vcmp.eq.s32.totalorder %v364_v46, %v1413_v41  ;;  %986 = vmatpush3.bf16.msk.msra.mxu0 %vm985_vm4, %v1233_v44  ;;  %v612_v46 = vstv (!%p927_p13), %s1478_s27 }
  0xcc   : > { %vm987_vm8 = vmpackc.low %vm420_vm7, %vm419_vm6 }
  0xcd   : > { %988 = vmatprep.subr.msk.bf16.mxu0 %vm987_vm8, %v1233_v44 }
  0xce   : > { %v313_v47 = vpop.permute.xlu0 %312  ;;  %v316_v48 = vpop.permute.xlu1 %315 }
  0xcf   : > { %vm403_vm9 = vcmp.eq.s32.totalorder %v313_v47, %v1413_v41  ;;  %vm404_vm10 = vcmp.eq.s32.totalorder %v316_v48, %v1413_v41  ;;  %v621_v47 = vstv (!%p927_p13), %s935_s5  ;;  %v693_v48 = vmul.f32 (!%p927_p13), -1.8564721, %v692_v40 }
  0xd0   : > { %vm989_vm11 = vmpackc.low %vm404_vm10, %vm403_vm9 }
  0xd1   : > { %990 = vmatpush3.bf16.msk.msra.mxu0 %vm989_vm11, %v1233_v44 }
  0xd2   : > { %v367_v49 = vpop.permute.xlu0 %366  ;;  %v370_v50 = vpop.permute.xlu1 %369 }
  0xd3   : > { %vm421_vm12 = vcmp.eq.s32.totalorder %v367_v49, %v1413_v41  ;;  %vm422_vm13 = vcmp.eq.s32.totalorder %v370_v50, %v1413_v41 }
  0xd4   : > { %vm991_vm14 = vmpackc.low %vm422_vm13, %vm421_vm12 }
  0xd5   : > { %992 = vmatprep.subr.msk.bf16.mxu0 %vm991_vm14, %v1233_v44 }
  0xd6   : > { %v319_v51 = vpop.permute.xlu0 %318  ;;  %v322_v52 = vpop.permute.xlu1 %321 }
  0xd7   : > { %vm405_vm15 = vcmp.eq.s32.totalorder %v319_v51, %v1413_v41  ;;  %vm406_vm0 = vcmp.eq.s32.totalorder %v322_v52, %v1413_v41  ;;  %v622_v51 = vmul.f32 (!%p927_p13), %v621_v47, %v1466_v14  ;;  %v1104_v52 = vpop.eup (!%p927_p13), %1103 }
  0xd8   : > { %vm993_vm1 = vmpackc.low %vm406_vm0, %vm405_vm15 }
  0xd9   : > { %994 = vmatpush3.bf16.msk.msra.mxu0 %vm993_vm1, %v1233_v44 }
  0xda   : > { %v373_v53 = vpop.permute.xlu0 %372  ;;  %v376_v54 = vpop.permute.xlu1 %375 }
  0xdb   : > { %vm423_vm2 = vcmp.eq.s32.totalorder %v373_v53, %v1413_v41  ;;  %vm424_vm3 = vcmp.eq.s32.totalorder %v376_v54, %v1413_v41  ;;  %v623_v54 = vstv (!%p927_p13), %s1480_s30 }
  0xdc   : > { %vm995_vm4 = vmpackc.low %vm424_vm3, %vm423_vm2 }
  0xdd   : > { %996 = vmatprep.subr.msk.bf16.mxu0 %vm995_vm4, %v1233_v44 }
  0xde   : > { %v325_v55 = vpop.permute.xlu0 %324  ;;  %v328_v56 = vpop.permute.xlu1 %327 }
  0xdf   : > { %vm407_vm5 = vcmp.eq.s32.totalorder %v325_v55, %v1413_v41  ;;  %vm408_vm6 = vcmp.eq.s32.totalorder %v328_v56, %v1413_v41  ;;  %v626_v55 = vstv (!%p927_p13), %s1482_s6  ;;  %v633_v56 = vstv (!%p927_p13), %s1484_s7 }
  0xe0   : > { %vm997_vm7 = vmpackc.low %vm408_vm6, %vm407_vm5 }
  0xe1   : > { %998 = vmatpush3.bf16.msk.msra.mxu0 %vm997_vm7, %v1233_v44 }
  0xe2   : > { %v379_v57 = vpop.permute.xlu0 %378  ;;  %v382_v58 = vpop.permute.xlu1 %381 }
  0xe3   : > { %vm425_vm8 = vcmp.eq.s32.totalorder %v379_v57, %v1413_v41  ;;  %vm426_vm9 = vcmp.eq.s32.totalorder %v382_v58, %v1413_v41  ;;  %v1106_v57 = vpop.eup (!%p927_p13), %1105  ;;  %v669_v58 = vmul.f32 (!%p927_p13), -1.37814, %v1104_v52 }
  0xe4   : > { %vm999_vm10 = vmpackc.low %vm426_vm9, %vm425_vm8 }
  0xe5   : > { %1000 = vmatprep.subr.msk.bf16.mxu0 %vm999_vm10, %v1233_v44 }
  0xe6   : > { %v331_v59 = vpop.permute.xlu0 %330  ;;  %v334_v60 = vpop.permute.xlu1 %333 }
  0xe7   : > { %vm409_vm11 = vcmp.eq.s32.totalorder %v331_v59, %v1413_v41  ;;  %vm410_vm12 = vcmp.eq.s32.totalorder %v334_v60, %v1413_v41  ;;  %v694_v59 = vmul.f32 (!%p927_p13), 1.442695, %v693_v48 }
  0xe8   : > { %vm1001_vm13 = vmpackc.low %vm410_vm12, %vm409_vm11 }
  0xe9   : > { %1002 = vmatpush3.bf16.msk.msra.mxu0 %vm1001_vm13, %v1233_v44  ;;  %1109 = vpow2.f32 (!%p927_p13), %v694_v59 }
  0xea   : > { %v385_v61 = vpop.permute.xlu0 %384  ;;  %v388_v62 = vpop.permute.xlu1 %387 }
  0xeb   : > { %vm427_vm14 = vcmp.eq.s32.totalorder %v385_v61, %v1413_v41  ;;  %vm428_vm15 = vcmp.eq.s32.totalorder %v388_v62, %v1413_v41  ;;  %v678_v62 = vrot.slane (!%p927_p13), %v1106_v57, 6 }
  0xec   : > { %vm1003_vm0 = vmpackc.low %vm428_vm15, %vm427_vm14 }
  0xed   : > { %1004 = vmatprep.subr.msk.bf16.mxu0 %vm1003_vm0, %v1233_v44 }
  0xee   : > { %v337_v63 = vpop.permute.xlu0 %336  ;;  %v340_v0 = vpop.permute.xlu1 %339 }
  0xef   : > { %vm411_vm1 = vcmp.eq.s32.totalorder %v337_v63, %v1413_v41  ;;  %vm412_vm2 = vcmp.eq.s32.totalorder %v340_v0, %v1413_v41  ;;  %v624_v63 = vadd.f32 (!%p927_p13), %v623_v54, %v622_v51  ;;  %v627_v0 = vmul.f32 (!%p927_p13), %v626_v55, %v1466_v14 }
  0xf0   : > { %vm1005_vm3 = vmpackc.low %vm412_vm2, %vm411_vm1 }
  0xf1   : > { %1006 = vmatpush3.bf16.msk.msra.mxu0 %vm1005_vm3, %v1233_v44 }
  0xf2   : > { %v391_v1 = vpop.permute.xlu0 %390  ;;  %v394_v2 = vpop.permute.xlu1 %393 }
  0xf3   : > { %vm429_vm4 = vcmp.eq.s32.totalorder %v391_v1, %v1413_v41  ;;  %vm430_vm5 = vcmp.eq.s32.totalorder %v394_v2, %v1413_v41  ;;  %v634_v1 = vmul.f32 (!%p927_p13), %v633_v56, %v1466_v14  ;;  %v671_v2 = vrot.slane (!%p927_p13), %v669_v58, 7 }
  0xf4   : > { %vm1007_vm6 = vmpackc.low %vm430_vm5, %vm429_vm4 }
  0xf5   : > { %1008 = vmatprep.subr.msk.bf16.mxu0 %vm1007_vm6, %v1233_v44 }
  0xf6   : > { %v343_v3 = vpop.permute.xlu0 %342  ;;  %v346_v4 = vpop.permute.xlu1 %345 }
  0xf7   : > { %vm413_vm7 = vcmp.eq.s32.totalorder %v343_v3, %v1413_v41  ;;  %vm414_vm8 = vcmp.eq.s32.totalorder %v346_v4, %v1413_v41  ;;  %v640_v4 = vstv (!%p927_p13), %s1489_s8 }
  0xf8   : > { %vm1009_vm9 = vmpackc.low %vm414_vm8, %vm413_vm7 }
  0xf9   : > { %1010 = vmatpush3.bf16.msk.msra.mxu0 %vm1009_vm9, %v1233_v44 }
  0xfa   : > { %v397_v5 = vpop.permute.xlu0 %396  ;;  %v400_v6 = vpop.permute.xlu1 %399 }
  0xfb   : > { %vm431_vm10 = vcmp.eq.s32.totalorder %v397_v5, %v1413_v41  ;;  %vm432_vm11 = vcmp.eq.s32.totalorder %v400_v6, %v1413_v41  ;;  %v1108_v5 = vpop.eup (!%p927_p13), %1107  ;;  %v629_v6 = vrot.slane (!%p927_p13), %v627_v0, 1 }
  0xfc   : > { %vm1011_vm12 = vmpackc.low %vm432_vm11, %vm431_vm10  ;;  %v1110_v32 = vpop.eup (!%p927_p13), %1109 }
  0xfd   : > { %1012 = vmatprep.subr.msk.bf16.mxu0 %vm1011_vm12, %v1233_v44  ;;  %v696_v33 = vadd.f32 (!%p927_p13), 1.4462701, %v1110_v32 }
  0xfe   : > { %v349_v7 = vpop.permute.xlu0 %348  ;;  %v352_v8 = vpop.permute.xlu1 %351 }
  0xff   : > { %vm415_vm13 = vcmp.eq.s32.totalorder %v349_v7, %v1413_v41  ;;  %vm416_vm14 = vcmp.eq.s32.totalorder %v352_v8, %v1413_v41  ;;  %v636_v7 = vrot.slane (!%p927_p13), %v634_v1, 2  ;;  %v644_v8 = vstv (!%p927_p13), %s1492_s9 }
 0x100   : > { %vm1013_vm15 = vmpackc.low %vm416_vm14, %vm415_vm13  ;;  %1111 = vlog2.f32 (!%p927_p13), %v696_v33 }
 0x101   : > { %1014 = vmatpush3.bf16.msk.msra.mxu0 %vm1013_vm15, %v1233_v44  ;;  %v597_v44 = vrot.slane (!%p927_p13), %v595_v37, 2 }
 0x104   : > { %567 = vmatmul.mubr.f32.vlgmr.msra.gmra.mrb[0].mxu0 %v1408_v34  ;;  %v583_v34 = vmul.f32 (!%p927_p13), %v582_v30, %v1466_v14 }
 0x106   : > { %v585_v41 = vadd.f32 (!%p927_p13), %v584_v31, %v583_v34 }
 0x108   : > { %v592_v49 = vadd.f32 (!%p927_p13), %v590_v42, %v585_v41 }
 0x10a   : > { %v599_v60 = vadd.f32 (!%p927_p13), %v597_v44, %v592_v49  ;;  %v1112_v42 = vpop.eup (!%p927_p13), %1111 }
 0x1d7   : > { %v980_v9 = vpop.f32.mrb[0].mxu0  ;;  %577 = sbr.rel (%p927_p13) target bundleno = 512 (0x200), region = 48 }
 0x1d8   : > { %v981_v11 = vpop.f32.mrb[1].mxu0 }
 0x1d9   : > { %v982_v12 = vadd.f32 %v981_v11, %v980_v9  ;;  %v673_v9 = vadd.f32 (!%p927_p13), %v1108_v5, %v671_v2 }
 0x1db   : > { %v572_v13 = vadd.f32 %v982_v12, %v497_v10  ;;  %v651_v12 = vstv (!%p927_p13), %s1495_s11  ;;  %v680_v18 = vmul.f32 (!%p927_p13), %v678_v62, %v673_v9 }
 0x1dd   : > { %573 = vst [vmem:[#allocation2] sm:$0x7] %v572_v13  ;;  %v631_v13 = vadd.f32 (!%p927_p13), %v629_v6, %v624_v63  ;;  %v681_v23 = vadd.f32 (!%p927_p13), 0.12262904, %v680_v18 }
 0x1df   : > { %v638_v21 = vadd.f32 %v636_v7, %v631_v13  ;;  %v709_v28 = vadd.f32 %v707_v19, %v681_v23 }
 0x1e1   : > { %710 = vst [vmem:[%s1372_s24 - $0x2] sm:$0x4] %v709_v28 }
 0x1e4   : > { %v579_v29 = vld [vmem:[#allocation2] sm:$0x7] }
 0x1e5   : > { %v602_v43 = vmul.f32 %v601_v38, %v579_v29  ;;  %v606_v45 = vmul.f32 %v605_v39, %v579_v29  ;;  %v613_v50 = vmul.f32 %v612_v46, %v579_v29  ;;  %v645_v11 = vmul.f32 %v644_v8, %v579_v29 }
 0x1e6   : > { %v641_v15 = vmul.f32 %v640_v4, %v579_v29  ;;  %v652_v17 = vmul.f32 %v651_v12, %v579_v29  ;;  %v718_v29 = vstv %s941_s3  ;;  %v724_v39 = vrot.slane %v1466_v14, 2 }
 0x1e7   : > { %v608_v53 = vrot.slane %v606_v45, 1  ;;  %v615_v61 = vrot.slane %v613_v50, 2  ;;  %v603_v3 = vadd.f32 %v602_v43, %v599_v60  ;;  %v647_v22 = vrot.slane %v645_v11, 1 }
 0x1e8   : > { %v642_v26 = vadd.f32 %v641_v15, %v638_v21  ;;  %v654_v27 = vrot.slane %v652_v17, 2  ;;  %v698_v43 = vmul.f32 0.6931472, %v1112_v42 }
 0x1e9   : > { %v610_v10 = vadd.f32 %v608_v53, %v603_v3 }
 0x1ea   : > { %v649_v30 = vadd.f32 %v647_v22, %v642_v26  ;;  %1113 = vrsqrt.f32 %v698_v43  ;;  %vm701_vm0 = vcmp.eq.f32.partialorder %v698_v43, inf  ;;  %v704_v45 = vand.u32 2147483648, %v698_v43 }
 0x1eb   : > { %v617_v20 = vadd.f32 %v615_v61, %v610_v10  ;;  %vm703_vm1 = vcmp.eq.f32.partialorder %v698_v43, 0.0 }
 0x1ec   : > { %v656_v34 = vadd.f32 %v654_v27, %v649_v30 }
 0x1ed   : > { %v618_v24 = vmax.f32 %v617_v20, 0.0 }
 0x1ee   : > { %v657_v36 = vmax.f32 %v656_v34, 0.0 }
 0x1ef   : > { %v717_v31 = vmul.f32 %v716_v25, %v618_v24 }
 0x1f0   : > { %v722_v38 = vmul.f32 %v721_v35, %v657_v36 }
 0x1f1   : > { %v719_v37 = vadd.f32 %v718_v29, %v717_v31 }
 0x1f3   : > { %v723_v40 = vadd.f32 %v722_v38, %v719_v37 }
 0x1f4   : > { %v1114_v44 = vpop.eup %1113 }
 0x1f5   : > { %v726_v41 = vadd.f32 %v724_v39, %v723_v40  ;;  %v700_v46 = vmul.f32 %v1114_v44, %v698_v43 }
 0x1f7   : > { %727 = vst [vmem:[%s1372_s24 + $0x2] sm:$0x1] %v726_v41  ;;  %v702_v47 = vsel %vm701_vm0, %v698_v43, %v700_v46 }
 0x1f8   : > { %v705_v48 = vsel %vm703_vm1, %v704_v45, %v702_v47 }
 0x1f9   : > { %v706_v49 = vsub.f32 0.7872602, %v705_v48 }
 0x1fb   : > { %v711_v50 = vsub.f32 %v706_v49, %v681_v23 }
 0x1fd   : > { %v712_v51 = vadd.f32 %v711_v50, %v660_v16 }
 0x1ff   : > { %713 = vst [vmem:[%s1372_s24 - $0x1] sm:$0x4] %v712_v51 }
 0x200 PF: > { %s945_s18 = sshll.u32 %s1216_s19, 6  ;;  %s742_s23 = sshll.u32 %s1372_s24, 4  ;;  %s743_s23 = int_to_ptr.vmem [resolvable:$true] %s742_s23 }
 0x201   : > { %s1521_s14 = scalar_lea.hbm %s1575_s4, %s945_s18  ;;  %s1586_s27 = sand.u32 1, %s1204_s16  }
 0x202   : > { %s729_s30 = scalar_lea.sflag [#allocation4], %s1586_s27  ;;  %s1130_s5 = scalar_lea.vmem %s743_s23, 64 }
 0x203   : > { %p1131_p0 = scmp.ne.s32.totalorder %s743_s23, %s1130_s5  ;;  %s1234_s6 = smov [#allocation6]  }
 0x204   : > { %s1134_s7 = sshll.u32 %s1234_s6, 4  ;;  %s1135_s7 = int_to_ptr.vmem [resolvable:$false] %s1134_s7 }
 0x205   : > { %p1132_p1 = pnand %p1131_p0, %p1310_p3  ;;  %s1136_s8 = scalar_lea.vmem %s1135_s7, 128 }
 0x206   : > { %p1137_p4 = scmp.lt.s32.totalorder %s743_s23, %s1135_s7  ;;  %p1138_p5 = scmp.lt.s32.totalorder %s1136_s8, %s1130_s5 }
 0x207   : > { %p1133_p2 = pneg %p1132_p1 }
 0x208   : > { %p1139_p6 = por %p1138_p5, %p1137_p4 }
 0x20a   : > { %p1140_p7 = pnand %p1139_p6, %p1133_p2 }
 0x20c   : > { %1143 = shalt.err (!%p1140_p7)
}
 0x20d   : > { %s1144_s19 = scalar_lea.hbm %s1521_s14, 64  ;;  %s1148_s11 = scalar_lea.hbm %s1575_s4, 128 }
 0x20e   : > { %p1145_p8 = scmp.ne.s32.totalorder %s1521_s14, %s1144_s19  ;;  %p1149_p10 = scmp.lt.u32.totalorder %s1521_s14, %s1575_s4 }
 0x20f   : > { %p1150_p12 = scmp.lt.u32.totalorder %s1148_s11, %s1144_s19  ;;  %p1152_p0 = scmp.lt.u32.totalorder %s1144_s19, %s1521_s14 }
 0x210   : > { %p1146_p9 = pnand %p1145_p8, %p1310_p3 }
 0x211   : > { %p1151_p13 = por %p1150_p12, %p1149_p10 }
 0x212   : > { %p1147_p11 = pneg %p1146_p9 }
 0x213   : > { %p1153_p1 = por %p1152_p0, %p1151_p13 }
 0x215   : > { %p1154_p2 = pnand %p1153_p1, %p1147_p11 }
 0x217   : > { %1157 = shalt.err (!%p1154_p2)
}
 0x218   : > { %1019 = dma.vmem_to_hbm [thread:$0]  (%p1310_p3), %s743_s23, 64, %s1521_s14, %s729_s30  }
 0x219 PF: > { %p1031_p4 = scmp.ge.s32.totalorder %s1228_s22, 2  ;;  %s754_s25 = sand.u32 1, %s1200_s15  }
 0x21a   : > { %p1587_p5 = scmp.ne.s32.totalorder %s1582_s29, 0  ;;  %s755_s18 = scalar_lea.sflag [#allocation4], %s754_s25 }
 0x21c   : > { %p1026_p6 = pnand %p1031_p4, %p1587_p5 }
 0x21e   : > { %1195 = dma.done.wait (!%p1026_p6), %s755_s18, 64  }
 0x21f   : > { %1197 = vsyncadd (!%p1026_p6), %s755_s18, 4294967232  ;;  %s18_s22 = sadd.s32 1, %s1228_s22   ;;  %s1588_s28 = sld [smem:[#allocation9_spill]] }
 0x220   : > { %p15_p7 = scmp.ge.s32.totalorder %s18_s22, 8   ;;  %s1589_s26 = sld [smem:[#allocation10_spill]] }
 0x221   : > { %s1590_s15 = smov %s1204_s16  ;;  %s1591_s16 = smov %s1208_s17 }
 0x222   : > { %s1592_s17 = smov %s1340_s10  ;;  %s1593_s18 = smov %s1220_s20 }
 0x223   : > { %s1594_s19 = smov %s1224_s21  ;;  %17 = sbr.rel (!%p15_p7) target bundleno = 8 (0x8), region = 90 }
 0x225   : > { %s1595_s20 = smov %s1588_s28 }
 0x226   : > { %s1596_s21 = smov %s1589_s26 }
 0x22a   :  { %760 = vsyncpa [#allocation4], 1 }
 0x22b   :  { %762 = vsyncpa [#allocation4 + $0x1], 1 }
 0x22c   :  { %763 = vsyncpa [#allocation5], 1 }
 0x22d   :  { %765 = vsyncpa [#allocation5 + $0x1], 1 }

</bundles_post_ra>
